<compile_context>
chip_gen: v7x
topology: tpu7x:2x2x1
jax: 0.10.0
libtpu: 0.0.40
codegen_flags: <defaults>
</compile_context>

<pallas_src>
import functools
from typing import NamedTuple

import jax
import jax.numpy as jnp
from jax.experimental import pallas as pl
from jax.experimental.pallas import tpu as pltpu


def _round_up(x, m):
    return (x + m - 1) // m * m


def _lane_align_for_device():
    """128 on v5e / unknown hardware, 256 on v6e / v7x (2x256^2 MXUs)."""
    try:
        kind = jax.devices()[0].device_kind.lower()
    except Exception:
        return 128
    return 256 if ("v6" in kind or "v7" in kind or "trillium" in kind) else 128


class TDNNFConfig(NamedTuple):
    feat_dim: int
    out_dim: int
    bottleneck_dim: int
    context_len: int
    subsampling: int
    mode: str              # "folded" | "bottleneck"
    d_pad: int
    out_pad: int
    bneck_pad: int
    bypass_tap: int        # context tap carrying the bypass, -1 if no bypass
    bypass_scale: float


# ---------------------------------------------------------------------------
# Kernels
# ---------------------------------------------------------------------------

def _tap_slab(xm_ref, xh_ref, c, subsampling):
    """Dense (tile_f, D_p) input slab for context tap c (no strided loads)."""
    r = c % subsampling          # subsampling phase of this tap
    k = c // subsampling         # per-phase frame offset of this tap
    xm = xm_ref[r]               # (tile_f, D_p)
    if k == 0:
        return xm
    xh = xh_ref[r]               # (H_a, D_p) halo frames of this phase
    return jnp.concatenate([xm[k:], xh[:k]], axis=0)


def _tdnnf_kernel_folded(xm_ref, xh_ref, w_ref, b_ref, o_ref, *,
                         context_len, subsampling):
    """Folded path: y = sum_c x_c @ W[c] + b  (bypass folded into tap lidx's W)."""
    acc = None
    for c in range(context_len):                       # small static loop, unrolled
        xa = _tap_slab(xm_ref, xh_ref, c, subsampling)
        p = jnp.dot(xa, w_ref[c], preferred_element_type=jnp.float32)
        acc = p if acc is None else acc + p
    o_ref[...] = (acc + b_ref[...]).astype(o_ref.dtype)


def _tdnnf_kernel_bneck(xm_ref, xh_ref, wb_ref, bb_ref, wa_ref, ba_ref, o_ref, *,
                        context_len, subsampling, bypass_tap, bypass_scale):
    """Two-matmul path: h = sum_c x_c @ WB[c] + bB ; y = h @ WA + bA (+ bypass)."""
    h = None
    byp = None
    for c in range(context_len):
        xa = _tap_slab(xm_ref, xh_ref, c, subsampling)
        if c == bypass_tap:
            byp = xa
        p = jnp.dot(xa, wb_ref[c], preferred_element_type=jnp.float32)
        h = p if h is None else h + p
    h = (h + bb_ref[...]).astype(wa_ref.dtype)          # bf16 operand for 2nd MXU pass
    acc = jnp.dot(h, wa_ref[...], preferred_element_type=jnp.float32) + ba_ref[...]
    if bypass_tap >= 0:
        acc = acc + byp.astype(jnp.float32) * bypass_scale
    o_ref[...] = acc.astype(o_ref.dtype)


# ---------------------------------------------------------------------------
# Parameter / input preparation (offline, f32; bf16 cast at the end)
# ---------------------------------------------------------------------------

def prepare_tdnnf_params(wB, bB, wA, bA, *, feat_dim, context_len, subsampling_factor,
                         bypass_scale, lane_align=None, fold_bottleneck_max=64):
    if float(subsampling_factor) != float(int(subsampling_factor)) or int(subsampling_factor) < 1:
        # TODO(synk): the subsampling_factor == 1.5 (add_padd / index_select) bypass
        # path of the original module is not implemented; only integer subsampling.
        raise ValueError("only integer subsampling_factor >= 1 is supported")
    C = int(context_len)
    S = int(subsampling_factor)
    D = int(feat_dim)
    out_dim, bneck = int(wA.shape[0]), int(wA.shape[1])
    assert tuple(wB.shape) == (bneck, D * C)
    if lane_align is None:
        lane_align = _lane_align_for_device()

    use_bypass = float(bypass_scale) > 0.0 and D == out_dim
    lidx = 0
    if use_bypass and C > 1:
        lidx = 1 if C == 2 else C // 2

    out_p = _round_up(out_dim, lane_align)
    d_p = _round_up(D, 128)
    if use_bypass:                      # bypass add needs matching padded widths
        out_p = max(out_p, d_p)
        d_p = out_p

    wB = jnp.asarray(wB, jnp.float32)
    bB = jnp.asarray(bB, jnp.float32).reshape(1, bneck)
    wA = jnp.asarray(wA, jnp.float32)
    bA = jnp.asarray(bA, jnp.float32).reshape(1, out_dim)

    folded = bneck <= fold_bottleneck_max
    if folded:
        w_eff = (wB.T @ wA.T).reshape(C, D, out_dim)          # fold in f32
        b_eff = bB @ wA.T + bA
        if use_bypass:
            w_eff = w_eff.at[lidx].add(
                jnp.eye(D, dtype=jnp.float32) * float(bypass_scale))
        w_eff = jnp.pad(w_eff, ((0, 0), (0, d_p - D), (0, out_p - out_dim)))
        b_eff = jnp.pad(b_eff, ((0, 0), (0, out_p - out_dim)))
        params = (w_eff.astype(jnp.bfloat16), b_eff)          # bias stays f32
        bneck_p = 0
    else:
        bneck_p = _round_up(bneck, 128)
        wB_t = wB.T.reshape(C, D, bneck)
        wB_t = jnp.pad(wB_t, ((0, 0), (0, d_p - D), (0, bneck_p - bneck)))
        bB_p = jnp.pad(bB, ((0, 0), (0, bneck_p - bneck)))
        wA_t = jnp.pad(wA.T, ((0, bneck_p - bneck), (0, out_p - out_dim)))
        bA_p = jnp.pad(bA, ((0, 0), (0, out_p - out_dim)))
        params = (wB_t.astype(jnp.bfloat16), bB_p, wA_t.astype(jnp.bfloat16), bA_p)

    cfg = TDNNFConfig(feat_dim=D, out_dim=out_dim, bottleneck_dim=bneck,
                      context_len=C, subsampling=S,
                      mode="folded" if folded else "bottleneck",
                      d_pad=d_p, out_pad=out_p, bneck_pad=bneck_p,
                      bypass_tap=lidx if use_bypass else -1,
                      bypass_scale=float(bypass_scale))
    return params, cfg


def _phase_split_input(x, *, C, S, d_p, tile_f, n_tiles):
    """Cast to bf16, pad D, split the frame axis by subsampling phase.

    Returns
      x_main: (mb, S, n_tiles*tile_f, d_p)  dense per-phase frame stream
      x_halo: (mb, n_tiles, S, H_a, d_p)    the (C-1)//S extra frames each tile needs
    """
    mb, T, D = x.shape
    x = x.astype(jnp.bfloat16)
    if d_p > D:
        x = jnp.pad(x, ((0, 0), (0, 0), (0, d_p - D)))
    H = (C - 1) // S
    H_a = max(H, 1)
    L_ph = n_tiles * tile_f + H              # per-phase frames needed (incl. halo)
    T_need = L_ph * S
    if T_need > T:
        x = jnp.pad(x, ((0, 0), (0, T_need - T), (0, 0)))
    elif T_need < T:
        x = x[:, :T_need, :]
    # original frame t = j*S + r  ->  phase r, per-phase index j  (S == 1: pure reshape)
    x_ph = x.reshape(mb, L_ph, S, d_p).transpose(0, 2, 1, 3)       # (mb, S, L_ph, d_p)
    x_main = x_ph[:, :, :n_tiles * tile_f, :]
    if H > 0:
        idx = jnp.arange(1, n_tiles + 1)[:, None] * tile_f + jnp.arange(H)[None, :]
        x_halo = jnp.transpose(x_ph[:, :, idx, :], (0, 2, 1, 3, 4))
    else:
        x_halo = jnp.zeros((mb, n_tiles, S, H_a, d_p), jnp.bfloat16)
    return x_main, x_halo


# ---------------------------------------------------------------------------
# Forward
# ---------------------------------------------------------------------------

def tdnnf_forward(x, params, cfg, *, frames_per_tile=256,
                  vmem_budget_bytes=44 * 1024 * 1024):
    """x: (mb, T, D) -> (mb, F, out_dim) float32, F = (T - C)//S + 1."""
    mb, T, D = x.shape
    assert D == cfg.feat_dim, (D, cfg.feat_dim)
    C, S = cfg.context_len, cfg.subsampling
    d_p, out_p = cfg.d_pad, cfg.out_pad
    F = (T - C) // S + 1
    if F <= 0:
        raise ValueError("input too short for the context window")

    const_bytes = sum(int(p.size) * p.dtype.itemsize for p in params)  # single-buffered
    H = (C - 1) // S
    H_a = max(H, 1)

    def vmem_need(tf):
        x_main_b = 2 * S * tf * d_p * 2                 # bf16, double-buffered
        x_halo_b = 2 * S * H_a * d_p * 2
        out_b = 2 * tf * out_p * 4                      # f32, double-buffered
        work_b = tf * (out_p + cfg.bneck_pad) * 4 + 2 * tf * d_p * 2
        return const_bytes + x_main_b + x_halo_b + out_b + work_b

    # frame tile: multiple of 16 sublanes (bf16 packing); shrink until it fits VMEM
    tile_f = min(_round_up(frames_per_tile, 16), _round_up(F, 16))
    while vmem_need(tile_f) > vmem_budget_bytes and tile_f > 16:
        tile_f = max(16, _round_up(tile_f // 2, 16))
    if vmem_need(tile_f) > vmem_budget_bytes:
        # TODO(synk): add an output-column (and bottleneck) grid axis so layers whose
        # weight slab alone exceeds the VMEM budget can still run.
        raise ValueError("TDNNF weights do not fit the per-core VMEM budget")
    assert tile_f > H

    n_tiles = pl.cdiv(F, tile_f)
    x_main, x_halo = _phase_split_input(x, C=C, S=S, d_p=d_p, tile_f=tile_f,
                                        n_tiles=n_tiles)

    def const_spec(shape):
        # constant-index block: single-buffered (no second copy of the weight slab)
        return pl.BlockSpec(shape, lambda b, f: (0,) * len(shape),
                            pipeline_mode=pl.Buffered(1))

    if cfg.mode == "folded":
        kern = functools.partial(_tdnnf_kernel_folded, context_len=C, subsampling=S)
        flops = 2 * mb * F * C * d_p * out_p
    else:
        kern = functools.partial(_tdnnf_kernel_bneck, context_len=C, subsampling=S,
                                 bypass_tap=cfg.bypass_tap,
                                 bypass_scale=cfg.bypass_scale)
        flops = 2 * mb * F * (C * d_p * cfg.bneck_pad + cfg.bneck_pad * out_p)

    w_specs = [const_spec(tuple(p.shape)) for p in params]
    out_bytes = mb * n_tiles * tile_f * out_p * 4
    cost = pl.CostEstimate(
        flops=int(flops), transcendentals=0,
        bytes_accessed=int(x_main.size * 2 + x_halo.size * 2 + const_bytes + out_bytes))

    vmem_limit = int(min(max(vmem_need(tile_f) + (8 << 20), 32 << 20), 56 << 20))

    out = pl.pallas_call(
        kern,
        out_shape=jax.ShapeDtypeStruct((mb, n_tiles * tile_f, out_p), jnp.float32),
        grid=(mb, n_tiles),   # batch outermost: megacore splits batches when mb >= 2
        in_specs=[
            pl.BlockSpec((None, S, tile_f, d_p), lambda b, f: (b, 0, f, 0)),
            pl.BlockSpec((None, None, S, H_a, d_p), lambda b, f: (b, f, 0, 0, 0)),
            *w_specs,
        ],
        out_specs=pl.BlockSpec((None, tile_f, out_p), lambda b, f: (b, f, 0)),
        compiler_params=pltpu.CompilerParams(
            dimension_semantics=("parallel", "parallel"),
            vmem_limit_bytes=vmem_limit),
        cost_estimate=cost,
    )(x_main, x_halo, *params)
    return out[:, :F, :cfg.out_dim]


# ---------------------------------------------------------------------------
# Pure-JAX reference of the original (un-folded) forward pass
# ---------------------------------------------------------------------------

def tdnnf_reference(x, params, *, context_len, subsampling_factor, bypass_scale):
    mb, T, D = x.shape
    wB, bB, wA, bA = params["wB"], params["bB"], params["wA"], params["bA"]
    out_dim = wA.shape[0]
    C, S = int(context_len), int(subsampling_factor)
    win, stride = D * C, D * S
    flat = x.reshape(mb, T * D)
    F = (T * D - win) // stride + 1
    idx = (jnp.arange(F) * stride)[:, None] + jnp.arange(win)[None, :]
    padded = flat[:, idx]
    h = padded @ wB.T + bB
    y = h @ wA.T + bA
    if bypass_scale > 0.0 and D == out_dim:
        if C > 1:
            lidx = C // 2
            ridx = -lidx if (C % 2 == 1) else (-lidx + 1)
            if C == 2:
                lidx, ridx = 1, None
            byp = x[:, lidx:ridx:S, :]
        else:
            byp = x[:, 0::S, :]
        y = y + byp * bypass_scale
    return y


# ---------------------------------------------------------------------------
# Demo / self-test
# ---------------------------------------------------------------------------

def _init_tdnnf_weights(key, D, out_dim, bneck, C):
    k2, k3, k4, k5 = jax.random.split(key, 4)
    feat_in = D * C
    # NaturalAffineTransform init: weight ~ N(0,1)/sqrt(feat_in*out), bias ~ N(0,1)
    wB = jax.random.normal(k2, (bneck, feat_in), jnp.float32) / jnp.sqrt(
        jnp.float32(feat_in * bneck))
    bB = jax.random.normal(k3, (1, bneck), jnp.float32)
    # nn.Linear(bneck, out_dim): uniform(-1/sqrt(in), 1/sqrt(in))
    bound = 1.0 / float(jnp.sqrt(jnp.float32(bneck)))
    wA = jax.random.uniform(k4, (out_dim, bneck), jnp.float32, -bound, bound)
    bA = jax.random.uniform(k5, (out_dim,), jnp.float32, -bound, bound)
    return wB, bB, wA, bA


def _run_case(key, *, mb, T, D, out_dim, bneck, C, S, bypass_scale):
    kx, kw = jax.random.split(key)
    x = jax.random.normal(kx, (mb, T, D), jnp.float32)
    wB, bB, wA, bA = _init_tdnnf_weights(kw, D, out_dim, bneck, C)
    params, cfg = prepare_tdnnf_params(
        wB, bB, wA, bA, feat_dim=D, context_len=C,
        subsampling_factor=S, bypass_scale=bypass_scale)
    fwd = jax.jit(tdnnf_forward, static_argnums=(2,))
    out = fwd(x, params, cfg)
    jax.block_until_ready(out)
    ref = tdnnf_reference(x, dict(wB=wB, bB=bB, wA=wA, bA=bA), context_len=C,
                          subsampling_factor=S, bypass_scale=bypass_scale)
    assert out.shape == ref.shape, (out.shape, ref.shape)
    err = float(jnp.max(jnp.abs(out - ref)))
    assert jnp.allclose(out, ref, atol=6e-2, rtol=6e-2), err


if __name__ == "__main__":
    key = jax.random.PRNGKey(0)
    k1, k2, k3 = jax.random.split(key, 3)
    # folded path (tiny bottleneck), S=1 (2-frame halo), bypass folded into the weight
    _run_case(k1, mb=2, T=20, D=32, out_dim=32, bneck=16, C=3, S=1, bypass_scale=0.66)
    # two-matmul path, S=3 (3 phases, no halo), bypass applied in-kernel as tap add
    _run_case(k2, mb=2, T=23, D=32, out_dim=32, bneck=128, C=3, S=3, bypass_scale=0.66)
    # two-matmul path, S=2, even context (1-frame halo), D not a multiple of 128, no bypass
    _run_case(k3, mb=1, T=19, D=48, out_dim=64, bneck=96, C=4, S=2, bypass_scale=0.66)
    print("KERNEL_OK")
</pallas_src>

<mosaic_0001>
module attributes {stable_mosaic.version = 11 : i64} {
  func.func @_tdnnf_kernel_folded(%arg0: i32, %arg1: i32, %arg2: memref<1x1x32x128xbf16, #tpu.memory_space<vmem>>, %arg3: memref<1x1x1x2x128xbf16, #tpu.memory_space<vmem>>, %arg4: memref<3x128x128xbf16, #tpu.memory_space<vmem>>, %arg5: memref<1x128xf32, #tpu.memory_space<vmem>>, %arg6: memref<1x32x128xf32, #tpu.memory_space<vmem>>) attributes {dimension_semantics = [#tpu.dimension_semantics<parallel>, #tpu.dimension_semantics<parallel>], iteration_bounds = array<i64: 2, 1>, scalar_prefetch = 0 : i64, scratch_operands = 0 : i64, tpu.core_type = #tpu.core_type<tc>, window_params = [{transform_indices = @transform_0, window_bounds = array<i64: 1, 1, 32, 128>}, {transform_indices = @transform_1, window_bounds = array<i64: 1, 1, 1, 2, 128>}, {pipeline_mode = #tpu.pipeline_mode<synchronous>, transform_indices = @transform_2, window_bounds = array<i64: 3, 128, 128>}, {pipeline_mode = #tpu.pipeline_mode<synchronous>, transform_indices = @transform_3, window_bounds = array<i64: 1, 128>}, {transform_indices = @transform_4, window_bounds = array<i64: 1, 32, 128>}]} {
    %c0 = arith.constant 0 : index
    %c0_0 = arith.constant 0 : index
    %c0_1 = arith.constant 0 : index
    %c0_2 = arith.constant 0 : index
    %0 = vector.load %arg2[%c0, %c0_0, %c0_1, %c0_2] : memref<1x1x32x128xbf16, #tpu.memory_space<vmem>>, vector<1x1x32x128xbf16>
    %1 = vector.shape_cast %0 : vector<1x1x32x128xbf16> to vector<32x128xbf16>
    %c0_3 = arith.constant 0 : index
    %c0_4 = arith.constant 0 : index
    %c0_5 = arith.constant 0 : index
    %2 = vector.load %arg4[%c0_3, %c0_4, %c0_5] : memref<3x128x128xbf16, #tpu.memory_space<vmem>>, vector<1x128x128xbf16>
    %3 = vector.shape_cast %2 : vector<1x128x128xbf16> to vector<128x128xbf16>
    %cst = arith.constant dense<0.000000e+00> : vector<32x128xf32>
    %4 = tpu.matmul %1, %3, %cst {dimension_numbers = #tpu.dot_dimension_numbers<[1], [0], [0], [1], [0, 0, 1, 1], [], []>} : vector<32x128xbf16>, vector<128x128xbf16>, vector<32x128xf32> -> vector<32x128xf32>
    %c0_6 = arith.constant 0 : index
    %c0_7 = arith.constant 0 : index
    %c0_8 = arith.constant 0 : index
    %c0_9 = arith.constant 0 : index
    %5 = vector.load %arg2[%c0_6, %c0_7, %c0_8, %c0_9] : memref<1x1x32x128xbf16, #tpu.memory_space<vmem>>, vector<1x1x32x128xbf16>
    %6 = vector.shape_cast %5 : vector<1x1x32x128xbf16> to vector<32x128xbf16>
    %c0_10 = arith.constant 0 : index
    %c0_11 = arith.constant 0 : index
    %c0_12 = arith.constant 0 : index
    %c0_13 = arith.constant 0 : index
    %c0_14 = arith.constant 0 : index
    %7 = vector.load %arg3[%c0_10, %c0_11, %c0_12, %c0_13, %c0_14] : memref<1x1x1x2x128xbf16, #tpu.memory_space<vmem>>, vector<1x1x1x2x128xbf16>
    %8 = vector.shape_cast %7 : vector<1x1x1x2x128xbf16> to vector<2x128xbf16>
    %9 = vector.extract_strided_slice %6 {offsets = [1, 0], sizes = [31, 128], strides = [1, 1]} : vector<32x128xbf16> to vector<31x128xbf16>
    %10 = vector.extract_strided_slice %8 {offsets = [0, 0], sizes = [1, 128], strides = [1, 1]} : vector<2x128xbf16> to vector<1x128xbf16>
    %11 = tpu.concatenate %9, %10 in 0 : vector<31x128xbf16>, vector<1x128xbf16> -> vector<32x128xbf16>
    %c1 = arith.constant 1 : index
    %c0_15 = arith.constant 0 : index
    %c0_16 = arith.constant 0 : index
    %12 = vector.load %arg4[%c1, %c0_15, %c0_16] : memref<3x128x128xbf16, #tpu.memory_space<vmem>>, vector<1x128x128xbf16>
    %13 = vector.shape_cast %12 : vector<1x128x128xbf16> to vector<128x128xbf16>
    %cst_17 = arith.constant dense<0.000000e+00> : vector<32x128xf32>
    %14 = tpu.matmul %11, %13, %cst_17 {dimension_numbers = #tpu.dot_dimension_numbers<[1], [0], [0], [1], [0, 0, 1, 1], [], []>} : vector<32x128xbf16>, vector<128x128xbf16>, vector<32x128xf32> -> vector<32x128xf32>
    %15 = arith.addf %4, %14 : vector<32x128xf32>
    %c0_18 = arith.constant 0 : index
    %c0_19 = arith.constant 0 : index
    %c0_20 = arith.constant 0 : index
    %c0_21 = arith.constant 0 : index
    %16 = vector.load %arg2[%c0_18, %c0_19, %c0_20, %c0_21] : memref<1x1x32x128xbf16, #tpu.memory_space<vmem>>, vector<1x1x32x128xbf16>
    %17 = vector.shape_cast %16 : vector<1x1x32x128xbf16> to vector<32x128xbf16>
    %c0_22 = arith.constant 0 : index
    %c0_23 = arith.constant 0 : index
    %c0_24 = arith.constant 0 : index
    %c0_25 = arith.constant 0 : index
    %c0_26 = arith.constant 0 : index
    %18 = vector.load %arg3[%c0_22, %c0_23, %c0_24, %c0_25, %c0_26] : memref<1x1x1x2x128xbf16, #tpu.memory_space<vmem>>, vector<1x1x1x2x128xbf16>
    %19 = vector.shape_cast %18 : vector<1x1x1x2x128xbf16> to vector<2x128xbf16>
    %20 = vector.extract_strided_slice %17 {offsets = [2, 0], sizes = [30, 128], strides = [1, 1]} : vector<32x128xbf16> to vector<30x128xbf16>
    %21 = tpu.concatenate %20, %19 in 0 : vector<30x128xbf16>, vector<2x128xbf16> -> vector<32x128xbf16>
    %c2 = arith.constant 2 : index
    %c0_27 = arith.constant 0 : index
    %c0_28 = arith.constant 0 : index
    %22 = vector.load %arg4[%c2, %c0_27, %c0_28] : memref<3x128x128xbf16, #tpu.memory_space<vmem>>, vector<1x128x128xbf16>
    %23 = vector.shape_cast %22 : vector<1x128x128xbf16> to vector<128x128xbf16>
    %cst_29 = arith.constant dense<0.000000e+00> : vector<32x128xf32>
    %24 = tpu.matmul %21, %23, %cst_29 {dimension_numbers = #tpu.dot_dimension_numbers<[1], [0], [0], [1], [0, 0, 1, 1], [], []>} : vector<32x128xbf16>, vector<128x128xbf16>, vector<32x128xf32> -> vector<32x128xf32>
    %25 = arith.addf %15, %24 : vector<32x128xf32>
    %c0_30 = arith.constant 0 : index
    %c0_31 = arith.constant 0 : index
    %26 = vector.load %arg5[%c0_30, %c0_31] : memref<1x128xf32, #tpu.memory_space<vmem>>, vector<1x128xf32>
    %27 = vector.broadcast %26 : vector<1x128xf32> to vector<32x128xf32>
    %28 = arith.addf %25, %27 : vector<32x128xf32>
    %c0_32 = arith.constant 0 : index
    %c0_33 = arith.constant 0 : index
    %c0_34 = arith.constant 0 : index
    %29 = vector.load %arg6[%c0_32, %c0_33, %c0_34] : memref<1x32x128xf32, #tpu.memory_space<vmem>>, vector<1x32x128xf32>
    %30 = vector.shape_cast %29 : vector<1x32x128xf32> to vector<32x128xf32>
    %31 = vector.shape_cast %28 : vector<32x128xf32> to vector<1x32x128xf32>
    tpu.vector_store %arg6[%c0_32, %c0_33, %c0_34], %31 {strides = array<i32>} : memref<1x32x128xf32, #tpu.memory_space<vmem>>, vector<1x32x128xf32>,
    return
  }
  func.func @transform_0(%arg0: i32, %arg1: i32) -> (i32, i32, i32, i32) {
    %c0_i32 = arith.constant 0 : i32
    %c0_i32_0 = arith.constant 0 : i32
    %c0_i32_1 = arith.constant 0 : i32
    return %arg0, %c0_i32, %arg1, %c0_i32_0 : i32, i32, i32, i32
  }
  func.func @transform_1(%arg0: i32, %arg1: i32) -> (i32, i32, i32, i32, i32) {
    %c0_i32 = arith.constant 0 : i32
    %c0_i32_0 = arith.constant 0 : i32
    %c0_i32_1 = arith.constant 0 : i32
    %c0_i32_2 = arith.constant 0 : i32
    return %arg0, %arg1, %c0_i32, %c0_i32_0, %c0_i32_1 : i32, i32, i32, i32, i32
  }
  func.func @transform_2(%arg0: i32, %arg1: i32) -> (i32, i32, i32) {
    %c0_i32 = arith.constant 0 : i32
    %c0_i32_0 = arith.constant 0 : i32
    %c0_i32_1 = arith.constant 0 : i32
    %c0_i32_2 = arith.constant 0 : i32
    return %c0_i32, %c0_i32_0, %c0_i32_1 : i32, i32, i32
  }
  func.func @transform_3(%arg0: i32, %arg1: i32) -> (i32, i32) {
    %c0_i32 = arith.constant 0 : i32
    %c0_i32_0 = arith.constant 0 : i32
    %c0_i32_1 = arith.constant 0 : i32
    return %c0_i32, %c0_i32_0 : i32, i32
  }
  func.func @transform_4(%arg0: i32, %arg1: i32) -> (i32, i32, i32) {
    %c0_i32 = arith.constant 0 : i32
    %c0_i32_0 = arith.constant 0 : i32
    return %arg0, %arg1, %c0_i32 : i32, i32, i32
  }
}

</mosaic_0001>

<bundles_post_ra>
// kernel: tdnnf_forward.1
= control target key start
LH: loop header
LB: loop body
LE: loop exit
PB: predicated region body
PF: predicated region fallthrough
CT: control target
= control target key end

     0   :  { %s1079_s15 = smov 0   ;;  %s1081_s16 = smov 0   ;;  %s1211_s0 = inlined_call_operand.vmem [shape: bf16[2,1,32,128], index: 0, kind: input, shape index: {}]   ;;  %s1212_s1 = inlined_call_operand.vmem [shape: bf16[2,1,1,2,128], index: 1, kind: input, shape index: {}]   ;;  %s1213_s2 = inlined_call_operand.vmem [shape: bf16[3,128,128], index: 2, kind: input, shape index: {}]   ;;  %s1214_s3 = inlined_call_operand.vmem [shape: f32[1,128], index: 3, kind: input, shape index: {}]   ;;  %s1215_s4 = inlined_call_operand.vmem [shape: f32[2,32,128], index: 4, kind: output, shape index: {}]  }
   0x1   :  { %s1083_s17 = smov 0  }
   0x2 LB: > { %s26_s18 = sadd.s32 1, %s1047_s16  ;;  %p811_p0 = scmp.ge.s32.totalorder %s1051_s17, 1  ;;  %s1051_s17 = sphi %s1083_s17, %s14_s17   ;;  %s1047_s16 = sphi %s1081_s16, %s1217_s16   ;;  %s1043_s15 = sphi %s1079_s15, %s1216_s15  }
   0x3   : > { %p28_p1 = scmp.ge.s32.totalorder %s26_s18, 2  ;;  %p196_p2 = scmp.lt.s32.totalorder %s1051_s17, 3 }
   0x5   : > { %s1219_s18 = smov (%p28_p1, %s26_s18), 0  ;;  %p197_p3 = pnand %p811_p0, %p196_p2 }
   0x6   : > { %v1002_v0 = vld [vmem:[%s1213_s2] sm:$0xff] (!%p197_p3)   ;;  %p237_p4 = scmp.lt.s32.totalorder (!%p197_p3), %s1043_s15, 1  ;;  %v1003_v1 = vld [vmem:[%s1213_s2 + $0x8] sm:$0xff] (!%p197_p3)   ;;  %v1004_v2 = vld [vmem:[%s1213_s2 + $0x10] sm:$0xff] (!%p197_p3)   ;;  %v316_v21 = vlaneseq (!%p197_p3)  ;;  %vm294_vm0 = vsmask.f32 (!%p197_p3), 7424 }
   0x7   : > { %200 = sbr.rel (%p197_p3) target bundleno = 291 (0x123), region = 36  ;;  %929 = vmatprep.subr.bf16.mxu0 (!%p197_p3), %v1002_v0  ;;  %v1005_v3 = vld [vmem:[%s1213_s2 + $0x18] sm:$0xff] (!%p197_p3)   ;;  %v1010_v4 = vld [vmem:[%s1213_s2 + $0x40] sm:$0xff] (!%p197_p3)   ;;  %v1013_v6 = vld [vmem:[%s1213_s2 + $0x48] sm:$0xff] (!%p197_p3)   ;;  %v1053_v24 = vmov (!%p197_p3), 1966171168  }
   0x8   : > { %930 = vmatpush3.bf16.msra.mxu0 (!%p197_p3), %v1002_v0  ;;  %909 = vmatprep.subr.bf16.mxu1 (!%p197_p3), %v1010_v4  ;;  %v1006_v7 = vld [vmem:[%s1213_s2 + $0x20] sm:$0xff] (!%p197_p3)   ;;  %v1007_v8 = vld [vmem:[%s1213_s2 + $0x28] sm:$0xff] (!%p197_p3)   ;;  %v1016_v9 = vld [vmem:[%s1213_s2 + $0x50] sm:$0xff] (!%p197_p3)   ;;  %v314_v25 = vunpack.c.l.s4 (!%p197_p3), %v1053_v24  ;;  %v317_v26 = vshrl.u32 (!%p197_p3), %v316_v21, 7  ;;  %vm548_vm1 = vcmask (!%p197_p3), 1046528   ;;  %vm332_vm2 = vcmask (!%p197_p3), 1047552  }
   0x9   : > { %931 = vmatprep.subr.bf16.mxu0 (!%p197_p3), %v1003_v1  ;;  %910 = vmatpush3.bf16.msra.mxu1 (!%p197_p3), %v1010_v4  ;;  %v1018_v12 = vld [vmem:[%s1213_s2 + $0x58] sm:$0xff] (!%p197_p3)   ;;  %v1008_v16 = vld [vmem:[%s1213_s2 + $0x30] sm:$0xff] (!%p197_p3)   ;;  %v1020_v17 = vld [vmem:[%s1213_s2 + $0x60] sm:$0xff] (!%p197_p3)  }
   0xa   : > { %911 = vmatprep.subr.bf16.mxu1 (!%p197_p3), %v1013_v6  ;;  %v1009_v20 = vld [vmem:[%s1213_s2 + $0x38] sm:$0xff] (!%p197_p3)   ;;  %v1022_v22 = vld [vmem:[%s1213_s2 + $0x68] sm:$0xff] (!%p197_p3)   ;;  %v1012_v27 = vld [vmem:[%s1213_s2 + $0x80] sm:$0xff] (!%p197_p3)   ;;  %v315_v29 = vunpack.c.0.s8 (!%p197_p3), %v314_v25 }
   0xb   : > { %v1024_v28 = vld [vmem:[%s1213_s2 + $0x70] sm:$0xff] (!%p197_p3)   ;;  %v1015_v34 = vld [vmem:[%s1213_s2 + $0x88] sm:$0xff] (!%p197_p3)   ;;  %v1026_v35 = vld [vmem:[%s1213_s2 + $0x78] sm:$0xff] (!%p197_p3)  }
   0xc   : > { %932 = vmatpush3.bf16.msra.mxu0 (!%p197_p3), %v1003_v1  ;;  %v318_v33 = vsub.s32 (!%p197_p3), %v315_v29, %v317_v26  ;;  %v1017_v40 = vld [vmem:[%s1213_s2 + $0x90] sm:$0xff] (!%p197_p3)   ;;  %vm333_vm3 = vmand (!%p197_p3), %vm332_vm2, %vm294_vm0  ;;  %v1019_v44 = vld [vmem:[%s1213_s2 + $0x98] sm:$0xff] (!%p197_p3)  }
   0xd   : > { %933 = vmatprep.subr.bf16.mxu0 (!%p197_p3), %v1004_v2  ;;  %912 = vmatpush3.bf16.msra.mxu1 (!%p197_p3), %v1013_v6  ;;  %v1021_v47 = vld [vmem:[%s1213_s2 + $0xa0] sm:$0xff] (!%p197_p3)   ;;  %v1023_v49 = vld [vmem:[%s1213_s2 + $0xa8] sm:$0xff] (!%p197_p3)   ;;  %v1025_v51 = vld [vmem:[%s1213_s2 + $0xb0] sm:$0xff] (!%p197_p3)  }
   0xe   : > { %s1221_s15 = smov (!%p237_p4, %s1043_s15), 1  ;;  %913 = vmatprep.subr.bf16.mxu1 %v1016_v9  ;;  %v1027_v53 = vld [vmem:[%s1213_s2 + $0xb8] sm:$0xff]   ;;  %v874_v61 = vld [vmem:[%s1214_s3] ss:$0 sm:$0xff] }
   0xf   : > { %s877_s25 = sshll.u32 %s1221_s15, 4  ;;  %s251_s5 = scalar_lea.vmem %s1212_s1, %s1221_s15 }
  0x10   : > { %s244_s28 = scalar_lea.vmem %s1211_s0, %s877_s25  ;;  %934 = vmatpush3.bf16.msra.mxu0 %v1004_v2  ;;  %v283_v30 = vld [vmem:[%s251_s5] sm:$0x1]  ;;  %s878_s30 = sshll.u32 %s1221_s15, 5 }
  0x11   : > { %v1118_v5 = vld [vmem:[%s244_s28] sm:$0xff]   ;;  %935 = vmatprep.subr.bf16.mxu0 %v1005_v3  ;;  %v1134_v11 = vld [vmem:[%s244_s28 + $0x8] sm:$0xff]   ;;  %914 = vmatpush3.bf16.msra.mxu1 %v1016_v9  ;;  %v319_v37 = vrot.slane %v283_v30, %v318_v33  ;;  %v553_v46 = vcombine.low %v283_v30, %v283_v30  ;;  %s260_s9 = scalar_lea.vmem %s1215_s4, %s878_s30 }
  0x12   : > { %945 = vmatprep.mubr.bf16.mxu0 %v1118_v5  ;;  %v298_v10 = vshll.u32 %v1118_v5, 16  ;;  %v296_v13 = vshrl.u32 %v1118_v5, 16  ;;  %v303_v15 = vshll.u32 %v1134_v11, 16  ;;  %915 = vmatprep.subr.bf16.mxu1 %v1018_v12  ;;  %v549_v31 = vrot.slane %v1118_v5, 1 }
  0x13   : > { %v550_v32 = vrot.slane %v1134_v11, 1  ;;  %v307_v36 = vshrl.u32 %v1134_v11, 16  ;;  %v326_v39 = vrot.slane %v319_v37, %v318_v33  ;;  %v560_v48 = vrot.slane %v553_v46, %v318_v33 }
  0x14   : > { %936 = vmatpush3.bf16.msra.mxu0 %v1005_v3  ;;  %v300_v14 = vrot.slane %v298_v10, 1  ;;  %v305_v19 = vrot.slane %v303_v15, 1 }
  0x15   : > { %937 = vmatprep.subr.bf16.mxu0 %v1006_v7  ;;  %916 = vmatpush3.bf16.msra.mxu1 %v1018_v12  ;;  %v551_v38 = vsel %vm548_vm1, %v549_v31, %v550_v32  ;;  %v328_v42 = vshll.u32 %v326_v39, 16  ;;  %v561_v50 = vcombine.low %v560_v48, %v560_v48 }
  0x16   : > { %v301_v18 = vor.u32 %v300_v14, %v296_v13  ;;  %917 = vmatprep.subr.bf16.mxu1 %v1020_v17  ;;  %v309_v41 = vor.u32 %v307_v36, %v305_v19 }
  0x17   : > { %v330_v43 = vrot.slane %v328_v42, 1  ;;  %v568_v52 = vrot.slane %v561_v50, %v318_v33 }
  0x18   : > { %938 = vmatpush3.bf16.msra.mxu0 %v1006_v7  ;;  %v306_v23 = vsel %vm294_vm0, %v301_v18, %v305_v19 }
  0x19   : > { %939 = vmatprep.subr.bf16.mxu0 %v1007_v8  ;;  %918 = vmatpush3.bf16.msra.mxu1 %v1020_v17  ;;  %v334_v45 = vsel %vm333_vm3, %v309_v41, %v330_v43  ;;  %v569_v54 = vcombine.low %v568_v52, %v568_v52 }
  0x1a   : > { %919 = vmatprep.subr.bf16.mxu1 %v1022_v22  ;;  %925 = vmatprep.mubr.bf16.mxu1 %v306_v23 }
  0x1b   : > { %v573_v55 = vsel %vm548_vm1, %v550_v32, %v569_v54 }
  0x1c   : > { %940 = vmatpush3.bf16.msra.mxu0 %v1007_v8 }
  0x1d   : > { %941 = vmatprep.subr.bf16.mxu0 %v1008_v16  ;;  %920 = vmatpush3.bf16.msra.mxu1 %v1022_v22 }
  0x1e   : > { %921 = vmatprep.subr.bf16.mxu1 %v1024_v28 }
  0x20   : > { %942 = vmatpush3.bf16.msra.mxu0 %v1008_v16 }
  0x21   : > { %943 = vmatprep.subr.bf16.mxu0 %v1009_v20  ;;  %922 = vmatpush3.bf16.msra.mxu1 %v1024_v28 }
  0x22   : > { %923 = vmatprep.subr.bf16.mxu1 %v1026_v35 }
  0x24   : > { %944 = vmatpush3.bf16.msra.mxu0 %v1009_v20 }
  0x25   : > { %949 = vmatprep.subr.bf16.mxu0 %v1012_v27  ;;  %924 = vmatpush3.bf16.msra.mxu1 %v1026_v35 }
  0x27   : > { %946 = vmatmul.mubr.bf16.vlgmr.msra.gmra.mrb[0].mxu0 %v1134_v11 }
  0x28   : > { %950 = vmatpush3.bf16.msra.mxu0 %v1012_v27  ;;  %965 = vmatprep.mubr.bf16.mxu0 %v551_v38 }
  0x29   : > { %951 = vmatprep.subr.bf16.mxu0 %v1015_v34  ;;  %926 = vmatmul.mubr.bf16.vlgmr.msra.gmra.mrb[0].mxu1 %v334_v45 }
  0x2c   : > { %952 = vmatpush3.bf16.msra.mxu0 %v1015_v34 }
  0x2d   : > { %953 = vmatprep.subr.bf16.mxu0 %v1017_v40 }
  0x30   : > { %954 = vmatpush3.bf16.msra.mxu0 %v1017_v40 }
  0x31   : > { %955 = vmatprep.subr.bf16.mxu0 %v1019_v44 }
  0x34   : > { %956 = vmatpush3.bf16.msra.mxu0 %v1019_v44 }
  0x35   : > { %957 = vmatprep.subr.bf16.mxu0 %v1021_v47 }
  0x38   : > { %958 = vmatpush3.bf16.msra.mxu0 %v1021_v47 }
  0x39   : > { %959 = vmatprep.subr.bf16.mxu0 %v1023_v49 }
  0x3c   : > { %960 = vmatpush3.bf16.msra.mxu0 %v1023_v49 }
  0x3d   : > { %961 = vmatprep.subr.bf16.mxu0 %v1025_v51 }
  0x40   : > { %962 = vmatpush3.bf16.msra.mxu0 %v1025_v51 }
  0x41   : > { %963 = vmatprep.subr.bf16.mxu0 %v1027_v53 }
  0x44   : > { %964 = vmatpush3.bf16.msra.mxu0 %v1027_v53 }
  0x47   : > { %966 = vmatmul.mubr.bf16.vlgmr.msra.gmra.mrb[0].mxu0 %v573_v55 }
  0xfc   : > { %v927_v56 = vpop.f32.mrb[0].mxu1 }
  0xfd   : > { %v434_v57 = vpop.f32.mrb[1].mxu1 }
  0xfe   : > { %v928_v58 = vpop.f32.mrb[2].mxu1 }
  0xff   : > { %v437_v59 = vpop.f32.mrb[3].mxu1 }
 0x11a   : > { %v967_v60 = vpop.f32.mrb[0].mxu0 }
 0x11b   : > { %v969_v62 = vadd.f32 %v967_v60, %v927_v56  ;;  %v674_v63 = vpop.f32.mrb[1].mxu0 }
 0x11c   : > { %v970_v0 = vadd.f32 %v674_v63, %v434_v57  ;;  %v968_v1 = vpop.f32.mrb[2].mxu0 }
 0x11d   : > { %v702_v2 = vadd.f32 %v969_v62, %v874_v61  ;;  %v971_v3 = vadd.f32 %v968_v1, %v928_v58  ;;  %v677_v4 = vpop.f32.mrb[3].mxu0 }
 0x11e   : > { %v700_v5 = vadd.f32 %v970_v0, %v874_v61  ;;  %v972_v6 = vadd.f32 %v677_v4, %v437_v59 }
 0x11f   : > { %706 = vst [vmem:[%s260_s9 + $0x10] sm:$0xff] %v702_v2  ;;  %v703_v7 = vadd.f32 %v971_v3, %v874_v61 }
 0x120   : > { %704 = vst [vmem:[%s260_s9] sm:$0xff] %v700_v5  ;;  %v701_v8 = vadd.f32 %v972_v6, %v874_v61 }
 0x121   : > { %707 = vst [vmem:[%s260_s9 + $0x18] sm:$0xff] %v703_v7 }
 0x122   : > { %705 = vst [vmem:[%s260_s9 + $0x8] sm:$0xff] %v701_v8 }
 0x123 PF: > { %s14_s17 = sadd.s32 1, %s1051_s17   ;;  %s1216_s15 = smov %s1047_s16 }
 0x124   : > { %p11_p5 = scmp.ge.s32.totalorder %s14_s17, 4   ;;  %s1217_s16 = smov %s1219_s18 }
 0x126   :  { %13 = sbr.rel (!%p11_p5) target bundleno = 2 (0x2), region = 71 }

</bundles_post_ra>
